<compile_context>
chip_gen: v5e
topology: v5e:2x2
jax: 0.10.0
libtpu: 0.0.40
codegen_flags: <defaults>
</compile_context>

<pallas_src>
import functools

import jax
import jax.numpy as jnp
from jax import lax
from jax.experimental import pallas as pl
from jax.experimental.pallas import tpu as pltpu


def _round_up(a, b):
    return (a + b - 1) // b * b


def _vmem_capacity_bytes():
    try:
        return int(pltpu.get_tpu_info().vmem_capacity_bytes)
    except Exception:
        return 64 * 1024 * 1024  # conservative fallback (v7x-safe)


def _cnn2d_kernel(patches_ref, w_ref, o_ref, *scratch,
                  num_p_tiles, p_valid, negative_slope, eps, store_conv):
    # patches_ref: (1, Kp, tile_p)   w_ref: (tile_c, Kp)
    # o_ref:       (1, tile_c, tile_p)
    # scratch:     [conv_ref (T, tile_c, tile_p) if store_conv],
    #              s1_ref (tile_c, 1) f32, s2_ref (tile_c, 1) f32.
    if store_conv:
        conv_ref, s1_ref, s2_ref = scratch
    else:
        s1_ref, s2_ref = scratch

    t = pl.program_id(2)

    @pl.when(t == 0)
    def _init():
        s1_ref[...] = jnp.zeros_like(s1_ref)
        s2_ref[...] = jnp.zeros_like(s2_ref)

    # ---- phase 0: conv tile (MXU) + single-pass stats accumulation ----------
    @pl.when(t < num_p_tiles)
    def _conv_phase():
        conv = jnp.dot(w_ref[...], patches_ref[0],
                       preferred_element_type=jnp.float32)   # (tile_c, tile_p)
        # No bias and zero-padded patch columns / K rows / Cout rows produce
        # exact zeros here, so no masking of padded columns is needed.
        s1_ref[...] += conv.sum(axis=1, keepdims=True)
        s2_ref[...] += jnp.square(conv).sum(axis=1, keepdims=True)
        if store_conv:
            conv_ref[t] = conv.astype(conv_ref.dtype)

    # ---- t == T: finalize per-channel mean / inverse std ONCE ---------------
    @pl.when(t == num_p_tiles)
    def _finalize():
        inv_p = 1.0 / p_valid
        mean = s1_ref[...] * inv_p
        var = jnp.maximum(s2_ref[...] * inv_p - jnp.square(mean), 0.0)
        s1_ref[...] = mean                  # reuse scratch: s1 <- mean
        s2_ref[...] = lax.rsqrt(var + eps)  #                s2 <- 1/std

    # ---- phase 1: normalize + (Leaky)ReLU, lane-dense store -----------------
    @pl.when(t >= num_p_tiles)
    def _norm_phase():
        j = t - num_p_tiles
        if store_conv:
            conv = conv_ref[j].astype(jnp.float32)
        else:
            # Conv scratch did not fit in VMEM: recompute the tile.  The patch
            # index_map re-points patches_ref at tile j in this mode.
            conv = jnp.dot(w_ref[...], patches_ref[0],
                           preferred_element_type=jnp.float32)
        y = (conv - s1_ref[...]) * s2_ref[...]
        y = jnp.where(y >= 0.0, y, negative_slope * y)   # slope==0 -> ReLU
        o_ref[0] = y.astype(o_ref.dtype)


def cnn2d_layer(x, weight, bias=None, *, stride, padding, k_relu=0.2, eps=1e-5,
                compute_dtype=jnp.bfloat16, out_dtype=jnp.float32,
                conv_scratch="auto"):
    """Fused Conv2d -> InstanceNorm2d -> LeakyReLU/ReLU.

    x: (N, Cin, H, W) f32, weight: (Cout, Cin, kH, kW), bias: (Cout,).
    The conv bias is accepted for API parity but NOT applied: a per-channel
    constant is cancelled exactly by InstanceNorm (mean shifts by the same
    constant, variance unchanged), so it is dead work in the fused op.
    compute_dtype: MXU input dtype (accumulation is always f32).  bf16 default.
    out_dtype:     returned activation dtype (f32 default; bf16 halves output HBM).
    conv_scratch:  "auto" | "store" | "recompute".
    """
    del bias  # exactly cancelled by InstanceNorm (see docstring)
    N, Cin, H, W = x.shape
    Cout, cin_w, kH, kW = weight.shape
    assert cin_w == Cin

    Ho = (H + 2 * padding - kH) // stride + 1
    Wo = (W + 2 * padding - kW) // stride + 1
    P = Ho * Wo
    K = Cin * kH * kW

    # --- im2col built directly in (N, K, P) order, already in compute_dtype
    #     (halves the dominant HBM stream for bf16); K runs (cin, kh, kw) to
    #     match weight.reshape(Cout, Cin*kH*kW).
    # TODO(synk): move im2col in-kernel (shifted matmuls over an activation
    # slab) to cut activation HBM traffic ~kH*kW.
    xc = x.astype(compute_dtype)
    xp = jnp.pad(xc, ((0, 0), (0, 0), (padding, padding), (padding, padding)))
    cols = []
    for di in range(kH):
        for dj in range(kW):
            cols.append(xp[:, :, di:di + stride * Ho:stride,
                            dj:dj + stride * Wo:stride])
    patches = jnp.stack(cols, axis=2).reshape(N, K, P)   # (N, K, Ho*Wo)

    cbytes = jnp.dtype(compute_dtype).itemsize
    obytes = jnp.dtype(out_dtype).itemsize

    # --- alignment / Cout tiling --------------------------------------------
    Kp = _round_up(K, 8)

    cout8 = _round_up(Cout, 8)
    if cout8 > 128:
        tile_c = 128                     # >1 Cout tiles -> parallel axis for v7x
        coutp = _round_up(Cout, tile_c)
    else:
        tile_c = cout8
        coutp = cout8
    n_c = coutp // tile_c

    # --- generation-aware VMEM budgeting -------------------------------------
    capacity = _vmem_capacity_bytes()
    vmem_budget = int(capacity * 0.8)

    p128 = _round_up(P, 128)
    conv_scratch_est = p128 * tile_c * cbytes
    if conv_scratch == "auto":
        store_conv = conv_scratch_est <= int(0.35 * vmem_budget)
    else:
        store_conv = (conv_scratch == "store")

    fixed = (2 * tile_c * Kp * cbytes                 # double-buffered weights
             + (conv_scratch_est if store_conv else 0)
             + (1 << 20))                             # slack
    per_col = 2 * Kp * cbytes + 2 * tile_c * obytes   # patch + out tiles / column
    avail = max(vmem_budget - fixed, 128 * per_col)
    tile_p = int(min(p128, 2048, max(128, (avail // per_col) // 128 * 128)))
    Pp = _round_up(P, tile_p)
    T = Pp // tile_p

    patches = jnp.pad(patches, ((0, 0), (0, Kp - K), (0, Pp - P)))
    w_mat = jnp.pad(weight.reshape(Cout, K).astype(compute_dtype),
                    ((0, coutp - Cout), (0, Kp - K)))

    slope = 0.0 if k_relu < 0 else float(k_relu)
    kernel = functools.partial(
        _cnn2d_kernel, num_p_tiles=T, p_valid=P, negative_slope=slope,
        eps=float(eps), store_conv=store_conv)

    if store_conv:
        # Phase 1 reads conv from scratch -> keep the last phase-0 patch tile
        # resident (no extra patch DMA during phase 1).
        patch_idx = lambda n, c, t: (n, 0, jnp.minimum(t, T - 1))
    else:
        # Recompute mode: phase 1 re-fetches patch tile j = t - T.
        patch_idx = lambda n, c, t: (n, 0, jnp.where(t < T, t, t - T))

    scratch_shapes = []
    if store_conv:
        scratch_shapes.append(pltpu.VMEM((T, tile_c, tile_p), compute_dtype))
    scratch_shapes += [pltpu.VMEM((tile_c, 1), jnp.float32),   # sum -> mean
                       pltpu.VMEM((tile_c, 1), jnp.float32)]   # sumsq -> 1/std

    vmem_need = (2 * Kp * tile_p * cbytes            # patch tiles (double-buffered)
                 + 2 * tile_c * Kp * cbytes          # weights (double-buffered)
                 + 2 * tile_c * tile_p * obytes      # output tiles
                 + (T * tile_c * tile_p * cbytes if store_conv else 0)
                 + 2 * max(tile_c, 8) * 128 * 4)     # stats (lane-padded)
    vmem_limit = int(min(max(int(vmem_need * 1.3) + (1 << 20), 4 << 20),
                         vmem_budget))

    out = pl.pallas_call(
        kernel,
        out_shape=jax.ShapeDtypeStruct((N, coutp, Pp), out_dtype),
        grid_spec=pltpu.PrefetchScalarGridSpec(
            num_scalar_prefetch=0,
            # Per (n, c): two sweeps over the P tiles — phase 0 (conv+stats),
            # phase 1 (normalize + activation + store).
            grid=(N, n_c, 2 * T),
            in_specs=[
                pl.BlockSpec((1, Kp, tile_p), patch_idx),
                pl.BlockSpec((tile_c, Kp), lambda n, c, t: (c, 0)),  # resident
            ],
            # NOTE: the output block index is pinned at 0 through phase 0 and
            # only advances during phase 1; this relies on Pallas writing an
            # output block back to HBM only when its block index changes
            # (standard accumulator semantics) — the unwritten block 0 is fully
            # overwritten at t == T before its first writeback.
            out_specs=pl.BlockSpec(
                (1, tile_c, tile_p),
                lambda n, c, t: (n, c, jnp.maximum(t, T) - T)),
            scratch_shapes=scratch_shapes,
        ),
        compiler_params=pltpu.CompilerParams(
            dimension_semantics=("parallel", "parallel", "arbitrary"),
            vmem_limit_bytes=vmem_limit,
        ),
    )(patches, w_mat)

    # (N, Cout, P) is already channels-first: slice padding, reshape to NCHW.
    return out[:, :Cout, :P].reshape(N, Cout, Ho, Wo)


def _reference(x, weight, bias, *, stride, padding, k_relu, eps=1e-5):
    conv = lax.conv_general_dilated(
        x, weight, (stride, stride),
        [(padding, padding), (padding, padding)],
        dimension_numbers=("NCHW", "OIHW", "NCHW"),
    ) + bias.reshape(1, -1, 1, 1)
    mean = conv.mean(axis=(2, 3), keepdims=True)
    var = ((conv - mean) ** 2).mean(axis=(2, 3), keepdims=True)
    normed = (conv - mean) * lax.rsqrt(var + eps)
    slope = 0.0 if k_relu < 0 else float(k_relu)
    return jnp.where(normed >= 0, normed, slope * normed)


def _make_case(key, n, cin, cout, h, w, k):
    kx, kw, kb = jax.random.split(key, 3)
    x = jax.random.normal(kx, (n, cin, h, w), dtype=jnp.float32)
    bound = 1.0 / ((cin * k * k) ** 0.5)
    weight = jax.random.uniform(kw, (cout, cin, k, k), minval=-bound,
                                maxval=bound, dtype=jnp.float32)
    bias = jax.random.uniform(kb, (cout,), minval=-bound, maxval=bound,
                              dtype=jnp.float32)
    return x, weight, bias


if __name__ == "__main__":
    key = jax.random.PRNGKey(0)

    # Case 1: module-consistent small shapes, default bf16 compute path.
    x, w, b = _make_case(key, 2, 4, 8, 16, 16, 3)
    out = cnn2d_layer(x, w, b, stride=1, padding=1, k_relu=0.2)
    out = jax.block_until_ready(out)
    ref = _reference(x, w, b, stride=1, padding=1, k_relu=0.2)
    assert out.shape == (2, 8, 16, 16)
    assert jnp.allclose(out, ref, atol=5e-2, rtol=5e-2), \
        float(jnp.max(jnp.abs(out - ref)))

    # Case 2: f32 compute + forced recompute fallback (tight tolerance).
    out32 = cnn2d_layer(x, w, b, stride=1, padding=1, k_relu=0.2,
                        compute_dtype=jnp.float32, conv_scratch="recompute")
    out32 = jax.block_until_ready(out32)
    assert jnp.allclose(out32, ref, atol=2e-4, rtol=2e-4), \
        float(jnp.max(jnp.abs(out32 - ref)))

    # Case 3: Cout > 128 (exercises the parallel Cout-tile axis), stride 2,
    # ReLU path (k_relu < 0), P < 128 padding; f32 compute for a tight check.
    x3, w3, b3 = _make_case(jax.random.PRNGKey(1), 1, 3, 160, 8, 8, 3)
    out3 = cnn2d_layer(x3, w3, b3, stride=2, padding=1, k_relu=-1.0,
                       compute_dtype=jnp.float32)
    out3 = jax.block_until_ready(out3)
    ref3 = _reference(x3, w3, b3, stride=2, padding=1, k_relu=-1.0)
    assert out3.shape == (1, 160, 4, 4)
    assert jnp.allclose(out3, ref3, atol=2e-4, rtol=2e-4), \
        float(jnp.max(jnp.abs(out3 - ref3)))

    print("KERNEL_OK")
</pallas_src>

<mosaic_0001>
module attributes {stable_mosaic.version = 11 : i64} {
  func.func @_cnn2d_kernel(%arg0: i32, %arg1: i32, %arg2: i32, %arg3: memref<1x40x256xbf16, #tpu.memory_space<vmem>>, %arg4: memref<8x40xbf16, #tpu.memory_space<vmem>>, %arg5: memref<1x8x256xf32, #tpu.memory_space<vmem>>, %arg6: memref<1x8x256xbf16, #tpu.memory_space<vmem>>, %arg7: memref<8x1xf32, #tpu.memory_space<vmem>>, %arg8: memref<8x1xf32, #tpu.memory_space<vmem>>) attributes {dimension_semantics = [#tpu.dimension_semantics<parallel>, #tpu.dimension_semantics<parallel>, #tpu.dimension_semantics<arbitrary>], iteration_bounds = array<i64: 2, 1, 2>, scalar_prefetch = 0 : i64, scratch_operands = 3 : i64, tpu.core_type = #tpu.core_type<tc>, window_params = [{transform_indices = @transform_0, window_bounds = array<i64: 1, 40, 256>}, {transform_indices = @transform_1, window_bounds = array<i64: 8, 40>}, {transform_indices = @transform_2, window_bounds = array<i64: 1, 8, 256>}]} {
    %c0_i32 = arith.constant 0 : i32
    %0 = arith.cmpi eq, %arg2, %c0_i32 : i32
    %1 = arith.extui %0 : i1 to i32
    %c0_i32_0 = arith.constant 0 : i32
    %2 = arith.cmpi ne, %1, %c0_i32_0 : i32
    scf.if %2 {
      %cst = arith.constant 0.000000e+00 : f32
      %12 = vector.broadcast %cst : f32 to vector<8x1xf32>
      %c0 = arith.constant 0 : index
      %c0_6 = arith.constant 0 : index
      %13 = vector.load %arg7[%c0, %c0_6] : memref<8x1xf32, #tpu.memory_space<vmem>>, vector<8x1xf32>
      tpu.vector_store %arg7[%c0, %c0_6], %12 {strides = array<i32>} : memref<8x1xf32, #tpu.memory_space<vmem>>, vector<8x1xf32>,
      %cst_7 = arith.constant 0.000000e+00 : f32
      %14 = vector.broadcast %cst_7 : f32 to vector<8x1xf32>
      %c0_8 = arith.constant 0 : index
      %c0_9 = arith.constant 0 : index
      %15 = vector.load %arg8[%c0_8, %c0_9] : memref<8x1xf32, #tpu.memory_space<vmem>>, vector<8x1xf32>
      tpu.vector_store %arg8[%c0_8, %c0_9], %14 {strides = array<i32>} : memref<8x1xf32, #tpu.memory_space<vmem>>, vector<8x1xf32>,
    } else {
    }
    %c1_i32 = arith.constant 1 : i32
    %3 = arith.cmpi slt, %arg2, %c1_i32 : i32
    %4 = arith.extui %3 : i1 to i32
    %c0_i32_1 = arith.constant 0 : i32
    %5 = arith.cmpi ne, %4, %c0_i32_1 : i32
    scf.if %5 {
      %c0 = arith.constant 0 : index
      %c0_6 = arith.constant 0 : index
      %12 = vector.load %arg4[%c0, %c0_6] : memref<8x40xbf16, #tpu.memory_space<vmem>>, vector<8x40xbf16>
      %c0_7 = arith.constant 0 : index
      %c0_8 = arith.constant 0 : index
      %c0_9 = arith.constant 0 : index
      %13 = vector.load %arg3[%c0_7, %c0_8, %c0_9] : memref<1x40x256xbf16, #tpu.memory_space<vmem>>, vector<1x40x256xbf16>
      %14 = vector.shape_cast %13 : vector<1x40x256xbf16> to vector<40x256xbf16>
      %cst = arith.constant dense<0.000000e+00> : vector<8x256xf32>
      %15 = tpu.matmul %12, %14, %cst {dimension_numbers = #tpu.dot_dimension_numbers<[1], [0], [0], [1], [0, 0, 1, 1], [], []>} : vector<8x40xbf16>, vector<40x256xbf16>, vector<8x256xf32> -> vector<8x256xf32>
      %c0_10 = arith.constant 0 : index
      %c0_11 = arith.constant 0 : index
      %16 = vector.load %arg7[%c0_10, %c0_11] : memref<8x1xf32, #tpu.memory_space<vmem>>, vector<8x1xf32>
      %cst_12 = arith.constant dense<0.000000e+00> : vector<8xf32>
      %17 = vector.multi_reduction <add>, %15, %cst_12 [1] : vector<8x256xf32> to vector<8xf32>
      %18 = vector.shape_cast %17 : vector<8xf32> to vector<8x1xf32>
      %19 = arith.addf %16, %18 : vector<8x1xf32>
      %c0_13 = arith.constant 0 : index
      %c0_14 = arith.constant 0 : index
      %20 = vector.load %arg7[%c0_13, %c0_14] : memref<8x1xf32, #tpu.memory_space<vmem>>, vector<8x1xf32>
      tpu.vector_store %arg7[%c0_13, %c0_14], %19 {strides = array<i32>} : memref<8x1xf32, #tpu.memory_space<vmem>>, vector<8x1xf32>,
      %c0_15 = arith.constant 0 : index
      %c0_16 = arith.constant 0 : index
      %21 = vector.load %arg8[%c0_15, %c0_16] : memref<8x1xf32, #tpu.memory_space<vmem>>, vector<8x1xf32>
      %22 = arith.mulf %15, %15 : vector<8x256xf32>
      %cst_17 = arith.constant dense<0.000000e+00> : vector<8xf32>
      %23 = vector.multi_reduction <add>, %22, %cst_17 [1] : vector<8x256xf32> to vector<8xf32>
      %24 = vector.shape_cast %23 : vector<8xf32> to vector<8x1xf32>
      %25 = arith.addf %21, %24 : vector<8x1xf32>
      %c0_18 = arith.constant 0 : index
      %c0_19 = arith.constant 0 : index
      %26 = vector.load %arg8[%c0_18, %c0_19] : memref<8x1xf32, #tpu.memory_space<vmem>>, vector<8x1xf32>
      tpu.vector_store %arg8[%c0_18, %c0_19], %25 {strides = array<i32>} : memref<8x1xf32, #tpu.memory_space<vmem>>, vector<8x1xf32>,
      %27 = arith.truncf %15 : vector<8x256xf32> to vector<8x256xbf16>
      %28 = arith.index_cast %arg2 : i32 to index
      %c0_20 = arith.constant 0 : index
      %c0_21 = arith.constant 0 : index
      %29 = vector.load %arg6[%28, %c0_20, %c0_21] : memref<1x8x256xbf16, #tpu.memory_space<vmem>>, vector<1x8x256xbf16>
      %30 = vector.shape_cast %29 : vector<1x8x256xbf16> to vector<8x256xbf16>
      %31 = vector.shape_cast %27 : vector<8x256xbf16> to vector<1x8x256xbf16>
      tpu.vector_store %arg6[%28, %c0_20, %c0_21], %31 {strides = array<i32>} : memref<1x8x256xbf16, #tpu.memory_space<vmem>>, vector<1x8x256xbf16>,
    } else {
    }
    %c1_i32_2 = arith.constant 1 : i32
    %6 = arith.cmpi eq, %arg2, %c1_i32_2 : i32
    %7 = arith.extui %6 : i1 to i32
    %c0_i32_3 = arith.constant 0 : i32
    %8 = arith.cmpi ne, %7, %c0_i32_3 : i32
    scf.if %8 {
      %c0 = arith.constant 0 : index
      %c0_6 = arith.constant 0 : index
      %12 = vector.load %arg7[%c0, %c0_6] : memref<8x1xf32, #tpu.memory_space<vmem>>, vector<8x1xf32>
      %cst = arith.constant 3.906250e-03 : f32
      %13 = vector.broadcast %cst : f32 to vector<8x1xf32>
      %14 = arith.mulf %12, %13 : vector<8x1xf32>
      %c0_7 = arith.constant 0 : index
      %c0_8 = arith.constant 0 : index
      %15 = vector.load %arg8[%c0_7, %c0_8] : memref<8x1xf32, #tpu.memory_space<vmem>>, vector<8x1xf32>
      %cst_9 = arith.constant 3.906250e-03 : f32
      %16 = vector.broadcast %cst_9 : f32 to vector<8x1xf32>
      %17 = arith.mulf %15, %16 : vector<8x1xf32>
      %18 = arith.mulf %14, %14 : vector<8x1xf32>
      %19 = arith.subf %17, %18 : vector<8x1xf32>
      %cst_10 = arith.constant 0.000000e+00 : f32
      %20 = vector.broadcast %cst_10 : f32 to vector<8x1xf32>
      %21 = arith.maximumf %19, %20 : vector<8x1xf32>
      %c0_11 = arith.constant 0 : index
      %c0_12 = arith.constant 0 : index
      %22 = vector.load %arg7[%c0_11, %c0_12] : memref<8x1xf32, #tpu.memory_space<vmem>>, vector<8x1xf32>
      tpu.vector_store %arg7[%c0_11, %c0_12], %14 {strides = array<i32>} : memref<8x1xf32, #tpu.memory_space<vmem>>, vector<8x1xf32>,
      %cst_13 = arith.constant 9.99999974E-6 : f32
      %23 = vector.broadcast %cst_13 : f32 to vector<8x1xf32>
      %24 = arith.addf %21, %23 : vector<8x1xf32>
      %25 = math.rsqrt %24 : vector<8x1xf32>
      %c0_14 = arith.constant 0 : index
      %c0_15 = arith.constant 0 : index
      %26 = vector.load %arg8[%c0_14, %c0_15] : memref<8x1xf32, #tpu.memory_space<vmem>>, vector<8x1xf32>
      tpu.vector_store %arg8[%c0_14, %c0_15], %25 {strides = array<i32>} : memref<8x1xf32, #tpu.memory_space<vmem>>, vector<8x1xf32>,
    } else {
    }
    %c1_i32_4 = arith.constant 1 : i32
    %9 = arith.cmpi sge, %arg2, %c1_i32_4 : i32
    %10 = arith.extui %9 : i1 to i32
    %c0_i32_5 = arith.constant 0 : i32
    %11 = arith.cmpi ne, %10, %c0_i32_5 : i32
    scf.if %11 {
      %c1_i32_6 = arith.constant 1 : i32
      %12 = arith.subi %arg2, %c1_i32_6 : i32
      %13 = arith.index_cast %12 : i32 to index
      %c0 = arith.constant 0 : index
      %c0_7 = arith.constant 0 : index
      %14 = vector.load %arg6[%13, %c0, %c0_7] : memref<1x8x256xbf16, #tpu.memory_space<vmem>>, vector<1x8x256xbf16>
      %15 = vector.shape_cast %14 : vector<1x8x256xbf16> to vector<8x256xbf16>
      %16 = arith.extf %15 : vector<8x256xbf16> to vector<8x256xf32>
      %c0_8 = arith.constant 0 : index
      %c0_9 = arith.constant 0 : index
      %17 = vector.load %arg7[%c0_8, %c0_9] : memref<8x1xf32, #tpu.memory_space<vmem>>, vector<8x1xf32>
      %18 = vector.broadcast %17 : vector<8x1xf32> to vector<8x256xf32>
      %19 = arith.subf %16, %18 : vector<8x256xf32>
      %c0_10 = arith.constant 0 : index
      %c0_11 = arith.constant 0 : index
      %20 = vector.load %arg8[%c0_10, %c0_11] : memref<8x1xf32, #tpu.memory_space<vmem>>, vector<8x1xf32>
      %21 = vector.broadcast %20 : vector<8x1xf32> to vector<8x256xf32>
      %22 = arith.mulf %19, %21 : vector<8x256xf32>
      %cst = arith.constant 0.000000e+00 : f32
      %23 = vector.broadcast %cst : f32 to vector<8x256xf32>
      %24 = arith.cmpf oge, %22, %23 : vector<8x256xf32>
      %cst_12 = arith.constant 2.000000e-01 : f32
      %25 = vector.broadcast %cst_12 : f32 to vector<8x256xf32>
      %26 = arith.mulf %25, %22 : vector<8x256xf32>
      %27 = arith.select %24, %22, %26 : vector<8x256xi1>, vector<8x256xf32>
      %c0_13 = arith.constant 0 : index
      %c0_14 = arith.constant 0 : index
      %c0_15 = arith.constant 0 : index
      %28 = vector.load %arg5[%c0_13, %c0_14, %c0_15] : memref<1x8x256xf32, #tpu.memory_space<vmem>>, vector<1x8x256xf32>
      %29 = vector.shape_cast %28 : vector<1x8x256xf32> to vector<8x256xf32>
      %30 = vector.shape_cast %27 : vector<8x256xf32> to vector<1x8x256xf32>
      tpu.vector_store %arg5[%c0_13, %c0_14, %c0_15], %30 {strides = array<i32>} : memref<1x8x256xf32, #tpu.memory_space<vmem>>, vector<1x8x256xf32>,
    } else {
    }
    return
  }
  func.func @transform_0(%arg0: i32, %arg1: i32, %arg2: i32) -> (i32, i32, i32) {
    %c0_i32 = arith.constant 0 : i32
    %0 = arith.minsi %arg2, %c0_i32 : i32
    %c0_i32_0 = arith.constant 0 : i32
    %c0_i32_1 = arith.constant 0 : i32
    return %arg0, %c0_i32_0, %0 : i32, i32, i32
  }
  func.func @transform_1(%arg0: i32, %arg1: i32, %arg2: i32) -> (i32, i32) {
    %c0_i32 = arith.constant 0 : i32
    %c0_i32_0 = arith.constant 0 : i32
    return %arg1, %c0_i32 : i32, i32
  }
  func.func @transform_2(%arg0: i32, %arg1: i32, %arg2: i32) -> (i32, i32, i32) {
    %c1_i32 = arith.constant 1 : i32
    %0 = arith.maxsi %arg2, %c1_i32 : i32
    %c1_i32_0 = arith.constant 1 : i32
    %1 = arith.subi %0, %c1_i32_0 : i32
    %c0_i32 = arith.constant 0 : i32
    return %arg0, %arg1, %1 : i32, i32, i32
  }
}

</mosaic_0001>

<bundles_post_ra>
// kernel: tpu_custom_call.1
= control target key start
LH: loop header
LB: loop body
LE: loop exit
PB: predicated region body
PF: predicated region fallthrough
CT: control target
= control target key end

     0   :  { %s1139_s0 = inlined_call_operand.hbm [shape: bf16[2,40,256], index: 0, kind: input, shape index: {}]   ;;  %s1140_s1 = inlined_call_operand.hbm [shape: bf16[8,40], index: 1, kind: input, shape index: {}]   ;;  %s1141_s2 = inlined_call_operand.hbm [shape: f32[2,8,256], index: 2, kind: output, shape index: {}]  }
   0x1   :  { %1146 = sst [smem:[#allocation19_spill]] %s1140_s1 }
   0x2   :  { %7 = vsyncpa [#allocation6], 0 }
   0x3   :  { %9 = vsyncpa [#allocation6 + $0x1], 0 }
   0x4   :  { %10 = vsyncpa [#allocation9], 0 }
   0x5   :  { %11 = vsyncpa [#allocation7], 0 }
   0x6   :  { %13 = vsyncpa [#allocation7 + $0x1], 0  ;;  %s908_s9 = smov 0   ;;  %s910_s10 = smov 0  }
   0x7   :  { %s912_s11 = smov 0   ;;  %s914_s12 = smov 0  }
   0x8   :  { %s916_s13 = smov 0   ;;  %s918_s14 = smov 0  }
   0x9   :  { %s920_s15 = smov 0   ;;  %s922_s16 = smov 0  }
   0xa   :  { %s924_s17 = smov 0   ;;  %s926_s18 = smov 0  }
   0xb   :  { %s928_s19 = smov 0  }
   0xc LB: > { %1147 = sst [smem:[#allocation14_spill]] %s846_s9  ;;  %s524_s20 = sadd.s32 4294967295, %s886_s19   ;;  %s886_s19 = sphi %s928_s19, %s19_s19   ;;  %s882_s18 = sphi %s926_s18, %s1172_s18   ;;  %s878_s17 = sphi %s924_s17, %s1163_s17   ;;  %s874_s16 = sphi %s922_s16, %s1171_s16   ;;  %s870_s15 = sphi %s920_s15, %s1162_s15   ;;  %s866_s14 = sphi %s918_s14, %s1170_s14   ;;  %s862_s13 = sphi %s916_s13, %s1169_s13   ;;  %s858_s12 = sphi %s914_s12, %s1168_s12   ;;  %s854_s11 = sphi %s912_s11, %s1167_s11   ;;  %s850_s10 = sphi %s910_s10, %s1166_s10   ;;  %s846_s9 = sphi %s908_s9, %s1165_s9  }
   0xd   : > { %1148 = sst [smem:[#allocation15_spill]] %s878_s17  ;;  %s525_s21 = sadd.s32 4294967294, %s886_s19  }
   0xe   : > { %s51_s22 = sadd.s32 1, %s866_s14  ;;  %p58_p0 = scmp.ne.s32.totalorder %s866_s14, %s862_s13 }
   0xf   : > { %p59_p1 = scmp.eq.s32.totalorder %s886_s19, 0  ;;  %p64_p2 = scmp.ne.s32.totalorder %s862_s13, %s858_s12 }
  0x10   : > { %p968_p3 = scmp.eq.s32.totalorder %s524_s20, 0  ;;  %s113_s24 = sadd.s32 1, %s854_s11 }
  0x11   : > { %p973_p4 = por %p59_p1, %p58_p0  ;;  %p123_p5 = scmp.ne.s32.totalorder %s854_s11, %s850_s10 }
  0x12   : > { %p981_p6 = por %p968_p3, %p64_p2  ;;  %p124_p7 = scmp.eq.s32.totalorder %s524_s20, 3 }
  0x13   : > { %p129_p8 = scmp.ne.s32.totalorder %s850_s10, %s846_s9  ;;  %p130_p9 = scmp.eq.s32.totalorder %s525_s21, 3 }
  0x14   : > { %p987_p10 = por %p124_p7, %p123_p5  ;;  %p528_p11 = scmp.ge.s32.totalorder %s886_s19, 1 }
  0x15   : > { %p992_p12 = por %p130_p9, %p129_p8  ;;  %p137_p13 = scmp.lt.s32.totalorder %s886_s19, 5 }
  0x16   : > { %s1155_s1 = sld [smem:[#allocation19_spill]]  ;;  %s888_s5 = smov [#allocation8]  }
  0x17   : > { %s1153_s28 = scalar_select %p992_p12, 1, 0 }
  0x18   : > { %p1000_p0 = pnand %p528_p11, %p137_p13  ;;  %s153_s6 = sshll.u32 %s888_s5, 4  ;;  %s154_s6 = int_to_ptr.vmem [resolvable:$true] %s153_s6 }
  0x19   : > { %1154 = sst [smem:[#allocation16_spill]] %s1153_s28  ;;  %p600_p2 = scmp.lt.s32.totalorder %s886_s19, 4 }
  0x1a   : > { %p587_p1 = pneg %p1000_p0  ;;  %s31_s8 = sadd.s32 1, %s878_s17 }
  0x1b   : > { %p1011_p7 = pnand %p600_p2, %p973_p4  ;;  %s38_s12 = sadd.s32 1, %s882_s18 }
  0x1c   : > { %s151_s3 = sshll.u32 %s1155_s1, 4  ;;  %p588_p5 = pnand %p587_p1, %p968_p3  ;;  %s152_s3 = int_to_ptr.hbm [resolvable:$true] %s151_s3 }
  0x1d   : > { %p32_p8 = scmp.ge.s32.totalorder %s31_s8, 2  ;;  %s164_s20 = sand.u32 1, %s866_s14  }
  0x1e   : > { %590 = dma.hbm_to_vmem [thread:$0]  (!%p588_p5), %s152_s3, 64, %s154_s6, [#allocation9]  }
  0x1f   : > { %s1174_s8 = smov (%p32_p8, %s31_s8), 0  ;;  %s1176_s12 = smov (!%p32_p8, %s38_s12), %s882_s18 }
  0x20   : > { %1158 = sst [smem:[#allocation17_spill]] %s1174_s8  ;;  %p40_p9 = scmp.ge.s32.totalorder %s1176_s12, 2 }
  0x21   : > { %s576_s25 = smul.u32 40, %s164_s20  ;;  %p733_p13 = pneg %p1011_p7 }
  0x22   : > { %s1178_s12 = smov (%p40_p9, %s1176_s12), 0  ;;  %s843_s6 = smul.u32 40, %s882_s18 }
  0x23   : > { %1159 = sst [smem:[#allocation18_spill]] %s1178_s12  ;;  %s46_s21 = ssub.s32 %s882_s18, %s1178_s12 }
  0x24   : > { %p49_p4 = scmp.eq.s32.totalorder %s46_s21, 0  ;;  %s168_s30 = scalar_lea.vmem [#allocation5], %s576_s25 }
  0x25   : > { %s180_s3 = sshll.u32 %s168_s30, 4  ;;  %s177_s17 = scalar_lea.hbm %s1139_s0, %s843_s6  ;;  %s181_s3 = int_to_ptr.vmem [resolvable:$true] %s180_s3 }
  0x26   : > { %s1028_s29 = scalar_select %p49_p4, %s866_s14, %s51_s22  }
  0x27   : > { %s1033_s5 = scalar_select %p49_p4, %s854_s11, %s113_s24  }
  0x28   : > { %s178_s28 = sshll.u32 %s177_s17, 4  ;;  %s165_s12 = scalar_lea.sflag [#allocation6], %s164_s20  ;;  %s179_s28 = int_to_ptr.hbm [resolvable:$true] %s178_s28 }
  0x29   : > { %s729_s21 = sshra.s32 %s179_s28, 4  ;;  %s736_s24 = scalar_lea.hbm %s1139_s0, 80  ;;  %s730_s21 = int_to_ptr.hbm [resolvable:$true] %s729_s21 }
  0x2a   : > { %s731_s9 = scalar_lea.hbm %s730_s21, 40 }
  0x2b   : > { %p732_p11 = scmp.ne.s32.totalorder %s730_s21, %s731_s9  ;;  %p738_p5 = scmp.lt.s32.totalorder %s736_s24, %s731_s9 }
  0x2d   : > { %p734_p1 = pnand %p733_p13, %p732_p11 }
  0x2f   : > { %p735_p2 = pneg %p734_p1 }
  0x31   : > { %p740_p8 = pnand %p738_p5, %p735_p2 }
  0x33   : > { %743 = shalt.err (!%p740_p8)
}
  0x34   : > { %s889_s1 = smov 128   ;;  %s890_s17 = smov 8  }
  0x35   : > { %594 = dma.hbm_to_vmem [thread:$0]  (!%p1011_p7), %s179_s28, 640, %s181_s3, %s165_s12, %s889_s1, %s889_s1, %s890_s17  }
  0x36   : > { %192 = sbr.rel (%p1000_p0) target bundleno = 548 (0x224), region = 28  ;;  %s194_s8 = sand.u32 (!%p1000_p0), 1, %s862_s13  }
  0x37   : > { %s578_s20 = smul.u32 (!%p1000_p0), 40, %s194_s8  ;;  %s195_s30 = scalar_lea.sflag (!%p1000_p0), [#allocation6], %s194_s8 }
  0x39   : > { %s1049_s6 = scalar_lea.vmem (!%p1000_p0), [#allocation5], %s578_s20 }
  0x3b   : > { %832 = dma.done.wait (%p981_p6), %s195_s30, 640  }
  0x3c   : > { %834 = vsyncadd (%p981_p6), %s195_s30, 4294966656 }
  0x3d   : > { %836 = dma.done.wait (%p968_p3), [#allocation9], 64  }
  0x3e   : > { %838 = vsyncadd (%p968_p3), [#allocation9], 4294967232  ;;  %s222_s9 = sand.u32 1, %s850_s10   ;;  %p536_p0 = scmp.ne.s32.totalorder %s870_s15, 0 }
  0x3f   : > { %s535_s28 = sshll.u32 %s222_s9, 4 }
  0x40   : > { %s1062_s4 = scalar_lea.vmem [#allocation10], %s535_s28  ;;  %236 = sbr.rel (%p536_p0) target bundleno = 72 (0x48), region = 40 }
  0x45   : > { %vm237_vm0 = vcmask 7168   ;;  %v891_v0 = vmov 0.0  }
  0x46   : > { %238 = vst.msk [vmem:[#allocation3] sm:$0xff] %vm237_vm0, %v891_v0 }
  0x47   : > { %239 = vst.msk [vmem:[#allocation4] sm:$0xff] %vm237_vm0, %v891_v0 }
  0x48 PF: > { %p537_p6 = scmp.ge.s32.totalorder %s870_s15, 1 }
  0x49   : > { %s574_s23 = sshll.u32 (!%p537_p6), %s870_s15, 3 }
  0x4a   : > { %243 = sbr.rel (%p537_p6) target bundleno = 351 (0x15f), region = 44  ;;  %s330_s26 = scalar_lea.vmem (!%p537_p6), [#allocation2], %s574_s23 }
  0x4f   : > { %v249_v1 = vld [vmem:[%s1049_s6 + $0x20] sm:$0xff]  ;;  %vm279_vm1 = vcmask 1043456   ;;  %v548_v4 = vld [vmem:[%s1049_s6 + $0x10] sm:$0xf]  ;;  %v573_v7 = vld [vmem:[%s1049_s6 + $0x14] sm:$0xf0] }
  0x50   : > { %v263_v2 = vunpack.c.l.b16 %v249_v1  ;;  %v264_v3 = vunpack.c.h.b16 %v249_v1  ;;  %v572_v8 = vld [vmem:[%s1049_s6 + $0x14] sm:$0xf]  ;;  %v550_v9 = vld [vmem:[%s1049_s6 + $0x18] sm:$0xf0]  ;;  %v549_v12 = vor.u32 %v573_v7, %v548_v4  ;;  %v540_v14 = vld [vmem:[%s1049_s6] sm:$0xf] }
  0x51   : > { %v553_v13 = vor.u32 %v572_v8, %v550_v9  ;;  %v571_v15 = vld [vmem:[%s1049_s6 + $0x4] sm:$0xf0]  ;;  %v570_v16 = vld [vmem:[%s1049_s6 + $0x4] sm:$0xf]  ;;  %v542_v17 = vld [vmem:[%s1049_s6 + $0x8] sm:$0xf0] }
  0x52   : > { %v269_v5 = vpack.c.b16 %v263_v2, %v263_v2  ;;  %v270_v6 = vpack.c.b16 %v264_v3, %v264_v3  ;;  %v541_v18 = vor.u32 %v571_v15, %v540_v14  ;;  %v545_v19 = vor.u32 %v570_v16, %v542_v17  ;;  %v244_v20 = vld [vmem:[#allocation8] sm:$0xf]  ;;  %v319_v33 = vld [vmem:[#allocation4] sm:$0xff] }
  0x53   : > { %vm275_vm2 = vcmask 326656   ;;  %v312_v30 = vld [vmem:[#allocation3] sm:$0xff]  ;;  %vm317_vm3 = vcmask 7168  }
  0x54   : > { %v281_v10 = vsel %vm279_vm1, %v269_v5, 0  ;;  %v284_v11 = vsel %vm279_vm1, %v270_v6, 0 }
  0x55   : > { %291 = vmatpush.bf16.msra.mxu0 %v281_v10  ;;  %304 = vmatpush.bf16.msra.mxu1 %v284_v11 }
  0x59   : > { %292 = vmatpush.bf16.msra.mxu0 %v549_v12  ;;  %305 = vmatpush.bf16.msra.mxu1 %v553_v13 }
  0x5d   : > { %293 = vmatpush.bf16.msra.mxu0 %v541_v18  ;;  %306 = vmatpush.bf16.msra.mxu1 %v545_v19 }
  0x60   : > { %554 = vmatmul.msk.bf16.vlgmr.msra.gmra.mxu0 %vm275_vm2, %v244_v20  ;;  %555 = vmatmul.msk.bf16.vlgmr.msra.gmra.mxu1 %vm275_vm2, %v244_v20 }
  0xdd   : > { %v295_v21 = vpop.f32.mrf.mxu0  ;;  %v308_v22 = vpop.f32.mrf.mxu1 }
  0xde   : > { %v327_v23 = vpack.c.bf16 %v308_v22, %v295_v21  ;;  %v313_v24 = vadd.f32 %v308_v22, %v295_v21  ;;  %v320_v25 = vmul.f32 %v295_v21, %v295_v21  ;;  %v321_v26 = vmul.f32 %v308_v22, %v308_v22 }
  0xe0   : > { %331 = vst [vmem:[%s330_s26] sm:$0xff] %v327_v23  ;;  %314 = vadd.xlane.f32.xlu0 %v313_v24  ;;  %v322_v29 = vadd.f32 %v321_v26, %v320_v25 }
  0xe5   : > { %v297_v27 = vpop.f32.mrf.mxu0  ;;  %v310_v28 = vpop.f32.mrf.mxu1 }
  0xe8   : > { %323 = vadd.xlane.f32.xlu0 %v322_v29 }
 0x153   : > { %v315_v31 = vpop.xlane.xlu0 %314 }
 0x154   : > { %v316_v32 = vadd.f32 %v315_v31, %v312_v30 }
 0x156   : > { %318 = vst.msk [vmem:[#allocation3] sm:$0xff] %vm317_vm3, %v316_v32 }
 0x15b   : > { %v324_v34 = vpop.xlane.xlu0 %323 }
 0x15c   : > { %v325_v35 = vadd.f32 %v324_v34, %v319_v33 }
 0x15e   : > { %326 = vst.msk [vmem:[#allocation4] sm:$0xff] %vm317_vm3, %v325_v35 }
 0x15f PF: > { %p558_p3 = scmp.ne.s32.totalorder %s870_s15, 1 }
 0x161   : > { %335 = sbr.rel (%p558_p3) target bundleno = 388 (0x184), region = 48 }
 0x166   : > { %v336_v36 = vld [vmem:[#allocation3] sm:$0xff]  ;;  %vm343_vm4 = vcmask 7168   ;;  %v338_v37 = vld [vmem:[#allocation4] sm:$0xff] }
 0x167   : > { %v337_v38 = vmul.f32 0.00390625, %v336_v36  ;;  %v339_v39 = vmul.f32 0.00390625, %v338_v37 }
 0x169   : > { %v340_v40 = vmul.f32 %v337_v38, %v337_v38  ;;  %344 = vst.msk [vmem:[#allocation3] sm:$0xff] %vm343_vm4, %v337_v38 }
 0x16b   : > { %v341_v41 = vsub.f32 %v339_v39, %v340_v40 }
 0x16d   : > { %v342_v42 = vmax.f32 %v341_v41, 0.0 }
 0x16f   : > { %v345_v43 = vadd.f32 1e-05, %v342_v42 }
 0x171   : > { %696 = vrsqrt.f32 %v345_v43  ;;  %vm352_vm5 = vweird.f32 %v345_v43 }
 0x177   : > { %v697_v44 = vpop.eup %696 }
 0x178   : > { %v347_v45 = vmul.f32 %v697_v44, %v345_v43  ;;  %vm353_vm6 = vweird.f32 %v697_v44 }
 0x179   : > { %vm354_vm7 = vmor %vm352_vm5, %vm353_vm6 }
 0x17a   : > { %v348_v46 = vmul.f32 %v697_v44, %v347_v45 }
 0x17c   : > { %v349_v47 = vmul.f32 0.5, %v348_v46 }
 0x17e   : > { %v350_v48 = vsub.f32 1.5, %v349_v47 }
 0x180   : > { %v351_v49 = vmul.f32 %v697_v44, %v350_v48 }
 0x182   : > { %v355_v50 = vsel %vm354_vm7, %v697_v44, %v351_v49 }
 0x183   : > { %356 = vst.msk [vmem:[#allocation4] sm:$0xff] %vm343_vm4, %v355_v50 }
 0x184 PF: > { %p559_p7 = scmp.lt.s32.totalorder %s870_s15, 1 }
 0x185   : > { %s560_s7 = sadd.s32 (!%p559_p7), 4294967295, %s870_s15 }
 0x186   : > { %360 = sbr.rel (%p559_p7) target bundleno = 527 (0x20f), region = 52  ;;  %s575_s12 = sshll.u32 (!%p559_p7), %s560_s7, 3 }
 0x187   : > { %s364_s3 = scalar_lea.vmem (!%p559_p7), [#allocation2], %s575_s12 }
 0x18b   : > { %v368_v51 = vld [vmem:[#allocation3] sm:$0xff]  ;;  %v892_v52 = vmov 0   ;;  %v376_v53 = vld [vmem:[#allocation4] sm:$0xff]  ;;  %v365_v55 = vld [vmem:[%s364_s3] sm:$0xff] }
 0x18c   : > { %698 = vset.pattern.permute.xlu0 %v892_v52  ;;  %v366_v56 = vunpack.c.l.bf16 %v365_v55  ;;  %v367_v57 = vunpack.c.h.bf16 %v365_v55 }
 0x18d   : > { %371 = vperm.xlu0 %698, %v368_v51  }
 0x195   : > { %379 = vperm.xlu0 %698, %v376_v53  }
 0x1ff   : > { %v372_v54 = vpop.permute.xlu0 %371 }
 0x200   : > { %v374_v58 = vsub.f32 %v366_v56, %v372_v54  ;;  %v375_v59 = vsub.f32 %v367_v57, %v372_v54 }
 0x207   : > { %v380_v60 = vpop.permute.xlu0 %379 }
 0x208   : > { %v382_v61 = vmul.f32 %v380_v60, %v374_v58  ;;  %v383_v62 = vmul.f32 %v380_v60, %v375_v59 }
 0x20a   : > { %vm384_vm8 = vcmp.ge.f32.partialorder %v382_v61, 0.0  ;;  %vm385_vm9 = vcmp.ge.f32.partialorder %v383_v62, 0.0  ;;  %v386_v63 = vmul.f32 0.2, %v382_v61  ;;  %v387_v0 = vmul.f32 0.2, %v383_v62 }
 0x20c   : > { %v388_v1 = vsel %vm384_vm8, %v382_v61, %v386_v63  ;;  %v389_v2 = vsel %vm385_vm9, %v383_v62, %v387_v0 }
 0x20d   : > { %390 = vst [vmem:[%s1062_s4] sm:$0xff] %v388_v1 }
 0x20e   : > { %391 = vst [vmem:[%s1062_s4 + $0x8] sm:$0xff] %v389_v2 }
 0x20f PF: > { %p400_p9 = scmp.gt.s32.totalorder %s870_s15, 1  ;;  %s566_s21 = sshll.u32 %s874_s16, 1 }
 0x210   : > { %s413_s24 = sshll.u32 %s1062_s4, 4  ;;  %s393_s28 = scalar_lea.sflag [#allocation7], %s222_s9  ;;  %s414_s24 = int_to_ptr.vmem [resolvable:$true] %s413_s24 }
 0x211   : > { %s1180_s15 = smov (!%p400_p9, %s870_s15), 1  ;;  %s779_s4 = scalar_lea.hbm %s1141_s2, 32 }
 0x212   : > { %s564_s22 = sadd.s32 4294967295, %s1180_s15 }
 0x213   : > { %s565_s25 = sshll.u32 %s564_s22, 1 }
 0x214   : > { %s409_s1 = sadd.s32 %s566_s21, %s565_s25 }
 0x215   : > { %s567_s17 = sshll.u32 %s409_s1, 3 }
 0x216   : > { %s411_s30 = scalar_lea.hbm %s1141_s2, %s567_s17 }
 0x217   : > { %s415_s6 = sshll.u32 %s411_s30, 4  ;;  %s416_s6 = int_to_ptr.hbm [resolvable:$true] %s415_s6 }
 0x218   : > { %s773_s23 = sshra.s32 %s416_s6, 4  ;;  %s774_s23 = int_to_ptr.hbm [resolvable:$true] %s773_s23 }
 0x219   : > { %s775_s26 = scalar_lea.hbm %s774_s23, 16  ;;  %p780_p1 = scmp.lt.s32.totalorder %s774_s23, %s1141_s2 }
 0x21a   : > { %p776_p4 = scmp.ne.s32.totalorder %s774_s23, %s775_s26  ;;  %p781_p2 = scmp.lt.s32.totalorder %s779_s4, %s775_s26 }
 0x21c   : > { %p777_p11 = pnand %p776_p4, %p987_p10  ;;  %p782_p5 = por %p781_p2, %p780_p1 }
 0x21e   : > { %p778_p13 = pneg %p777_p11 }
 0x220   : > { %p783_p8 = pnand %p782_p5, %p778_p13 }
 0x222   : > { %786 = shalt.err (!%p783_p8)
}
 0x223   : > { %585 = dma.vmem_to_hbm [thread:$0]  (%p987_p10), %s414_s24, 256, %s416_s6, %s393_s28  }
 0x224 PF: > { %s1160_s9 = sld [smem:[#allocation14_spill]]  ;;  %p602_p0 = scmp.ge.s32.totalorder %s886_s19, 2 }
 0x226   : > { %p596_p6 = pnand %p602_p0, %p992_p12 }
 0x228   : > { %p597_p3 = pneg %p596_p6 }
 0x22a   : > { %s427_s21 = sand.u32 1, %s1160_s9  }
 0x22b   : > { %s428_s22 = scalar_lea.sflag [#allocation7], %s427_s21 }
 0x22c   : > { %840 = dma.done.wait (%p597_p3), %s428_s22, 256  }
 0x22d   : > { %842 = vsyncadd (%p597_p3), %s428_s22, 4294967040  ;;  %s19_s19 = sadd.s32 1, %s886_s19   ;;  %s1162_s15 = sld [smem:[#allocation15_spill]] }
 0x22e   : > { %p16_p7 = scmp.ge.s32.totalorder %s19_s19, 6   ;;  %s1163_s17 = sld [smem:[#allocation17_spill]] }
 0x22f   : > { %s1164_s27 = sld [smem:[#allocation18_spill]]  ;;  %s1165_s9 = smov %s850_s10 }
 0x230   : > { %s1166_s10 = smov %s854_s11  ;;  %s1167_s11 = smov %s1033_s5 }
 0x231   : > { %s1168_s12 = smov %s862_s13  ;;  %s1169_s13 = smov %s866_s14 }
 0x232   : > { %s1170_s14 = smov %s1028_s29  ;;  %s1171_s16 = smov %s882_s18 }
 0x233   :  { %18 = sbr.rel (!%p16_p7) target bundleno = 12 (0xc), region = 96 }
 0x235   : > { %s1172_s18 = smov %s1164_s27 }
 0x238   :  { %434 = vsyncpa [#allocation6], 1 }
 0x239   :  { %436 = vsyncpa [#allocation6 + $0x1], 1 }
 0x23a   :  { %437 = vsyncpa [#allocation9], 1 }
 0x23b   :  { %438 = vsyncpa [#allocation7], 1 }
 0x23c   :  { %440 = vsyncpa [#allocation7 + $0x1], 1 }

</bundles_post_ra>
